<compile_context>
chip_gen: v5e
topology: v5e:2x2
jax: 0.10.0
libtpu: 0.0.40
codegen_flags: <defaults>
</compile_context>

<pallas_src>
import functools

import jax
import jax.numpy as jnp
from jax.experimental import pallas as pl
from jax.experimental.pallas import tpu as pltpu


def _round_up(x, m):
    return (x + m - 1) // m * m


# ---------------------------------------------------------------------------
# Fused two-layer GCN kernel.
#
# Grid axis k tiles the Fin reduction of X @ W1.  The f32 accumulator lives in
# VMEM scratch; on the last k step we finish both layers:
#   h1  = relu(A @ (X @ W1) + b1)
#   out = A @ (h1 @ W2) + b2
# ---------------------------------------------------------------------------
def _fused_gcn_kernel(a_ref, x_ref, w1_ref, b1_ref, w2_ref, b2_ref,
                      o_ref, xw1_acc):
    k = pl.program_id(0)

    @pl.when(k == 0)
    def _init():
        xw1_acc[...] = jnp.zeros_like(xw1_acc)

    # Accumulate X @ W1 over Fin tiles (bf16 inputs, f32 accumulation).
    xw1_acc[...] += jnp.dot(x_ref[...], w1_ref[...],
                            preferred_element_type=jnp.float32)

    @pl.when(k == pl.num_programs(0) - 1)
    def _finalize():
        a = a_ref[...]                                     # bf16 0/1 adjacency
        # Layer 1: aggregate then bias + ReLU.
        h1 = jnp.dot(a, xw1_acc[...].astype(jnp.bfloat16),
                     preferred_element_type=jnp.float32)
        h1 = jnp.maximum(h1 + b1_ref[...], 0.0)
        # Layer 2: linear then aggregate then bias.
        hw2 = jnp.dot(h1.astype(jnp.bfloat16), w2_ref[...],
                      preferred_element_type=jnp.float32)
        out = jnp.dot(a, hw2.astype(jnp.bfloat16),
                      preferred_element_type=jnp.float32) + b2_ref[...]
        o_ref[...] = out.astype(o_ref.dtype)


# ---------------------------------------------------------------------------
# One-time (out of the hot path) padding / casting helpers.
# ---------------------------------------------------------------------------
def prepare_graph_inputs(adj, features):
    """Pad node / feature dims to multiples of 128 and cast to bf16."""
    n = adj.shape[0]
    fin = features.shape[1]
    n_p = _round_up(n, 128)
    fin_p = _round_up(fin, 128)
    if n_p != n:
        adj = jnp.zeros((n_p, n_p), adj.dtype).at[:n, :n].set(adj)
    if n_p != n or fin_p != fin:
        features = jnp.zeros((n_p, fin_p), features.dtype).at[:n, :fin].set(features)
    return adj.astype(jnp.bfloat16), features.astype(jnp.bfloat16)


def prepare_params(params):
    """Pad weights/biases to lane multiples; weights -> bf16, biases -> f32."""
    w1, b1, w2, b2 = params
    fin, hid = w1.shape
    _, out = w2.shape
    fin_p = _round_up(fin, 128)
    hid_p = _round_up(hid, 128)
    out_p = _round_up(out, 128)
    w1_p = jnp.zeros((fin_p, hid_p), jnp.bfloat16).at[:fin, :hid].set(
        w1.astype(jnp.bfloat16))
    b1_p = jnp.zeros((1, hid_p), jnp.float32).at[0, :hid].set(b1)
    w2_p = jnp.zeros((hid_p, out_p), jnp.bfloat16).at[:hid, :out].set(
        w2.astype(jnp.bfloat16))
    b2_p = jnp.zeros((1, out_p), jnp.float32).at[0, :out].set(b2)
    return w1_p, b1_p, w2_p, b2_p


# ---------------------------------------------------------------------------
# Forward pass: Net.forward == layer2(g, relu(layer1(g, feat)))
# ---------------------------------------------------------------------------
def net_forward(adj_p, x_p, padded_params, *, n_nodes, out_feats):
    w1_p, b1_p, w2_p, b2_p = padded_params
    n_p = adj_p.shape[0]
    fin_p = x_p.shape[1]
    hid_p = w1_p.shape[1]
    out_p = w2_p.shape[1]

    # Reduction tile over Fin: largest aligned tile that divides fin_p.
    tk = 512 if fin_p % 512 == 0 else 128
    num_k = fin_p // tk

    out_padded = pl.pallas_call(
        _fused_gcn_kernel,
        out_shape=jax.ShapeDtypeStruct((n_p, out_p), jnp.float32),
        grid=(num_k,),
        in_specs=[
            pl.BlockSpec((n_p, n_p), lambda k: (0, 0)),      # A (resident)
            pl.BlockSpec((n_p, tk), lambda k: (0, k)),       # X k-tile
            pl.BlockSpec((tk, hid_p), lambda k: (k, 0)),     # W1 k-tile
            pl.BlockSpec((1, hid_p), lambda k: (0, 0)),      # b1
            pl.BlockSpec((hid_p, out_p), lambda k: (0, 0)),  # W2
            pl.BlockSpec((1, out_p), lambda k: (0, 0)),      # b2
        ],
        out_specs=pl.BlockSpec((n_p, out_p), lambda k: (0, 0)),
        scratch_shapes=[pltpu.VMEM((n_p, hid_p), jnp.float32)],
        compiler_params=pltpu.CompilerParams(
            dimension_semantics=("arbitrary",)),
    )(adj_p, x_p, w1_p, b1_p, w2_p, b2_p)

    return out_padded[:n_nodes, :out_feats]


# ---------------------------------------------------------------------------
# Parameter init mimicking nn.Linear (uniform +-1/sqrt(fan_in)).
# Weights are stored pre-transposed: [F_in, F_out].
# ---------------------------------------------------------------------------
def init_params(key, in_feats, hidden, out_feats):
    k1, k2, k3, k4 = jax.random.split(key, 4)
    lim1 = 1.0 / jnp.sqrt(jnp.float32(in_feats))
    lim2 = 1.0 / jnp.sqrt(jnp.float32(hidden))
    w1 = jax.random.uniform(k1, (in_feats, hidden), jnp.float32, -lim1, lim1)
    b1 = jax.random.uniform(k2, (hidden,), jnp.float32, -lim1, lim1)
    w2 = jax.random.uniform(k3, (hidden, out_feats), jnp.float32, -lim2, lim2)
    b2 = jax.random.uniform(k4, (out_feats,), jnp.float32, -lim2, lim2)
    return w1, b1, w2, b2


# Pure-JAX references.
def _reference_f32(adj, x, params):
    w1, b1, w2, b2 = params
    h = jnp.maximum((adj @ x) @ w1 + b1, 0.0)
    return (adj @ h) @ w2 + b2


def _reference_bf16(adj, x, params):
    """Emulates the kernel's precision (bf16 MXU inputs, f32 accumulation)."""
    w1, b1, w2, b2 = params
    bf = lambda t: t.astype(jnp.bfloat16)
    xw1 = jnp.dot(bf(x), bf(w1), preferred_element_type=jnp.float32)
    h1 = jnp.maximum(
        jnp.dot(bf(adj), bf(xw1), preferred_element_type=jnp.float32) + b1, 0.0)
    hw2 = jnp.dot(bf(h1), bf(w2), preferred_element_type=jnp.float32)
    return jnp.dot(bf(adj), bf(hw2), preferred_element_type=jnp.float32) + b2


if __name__ == "__main__":
    # Module-implied sizes: in_feats=1433, hidden=16, out=7 (Cora-style GCN).
    N = 128
    IN_FEATS = 1433
    HIDDEN = 16
    OUT_FEATS = 7

    key = jax.random.PRNGKey(0)
    k_feat, k_adj, k_param = jax.random.split(key, 3)

    features = jax.random.normal(k_feat, (N, IN_FEATS), jnp.float32)

    # Sparse random directed graph with self-loops, as a dense adjacency.
    # A[i, j] = 1 means node j sends a message to node i (copy_src -> sum).
    adj = (jax.random.uniform(k_adj, (N, N)) < 0.05).astype(jnp.float32)
    adj = jnp.maximum(adj, jnp.eye(N, dtype=jnp.float32))

    params = init_params(k_param, IN_FEATS, HIDDEN, OUT_FEATS)

    # One-time padding / casting (outside the forward hot path).
    adj_p, x_p = prepare_graph_inputs(adj, features)
    padded_params = prepare_params(params)

    out = net_forward(adj_p, x_p, padded_params,
                      n_nodes=N, out_feats=OUT_FEATS)
    out = jax.block_until_ready(out)

    assert out.shape == (N, OUT_FEATS)
    # Tight check vs a reference with the same bf16-input / f32-accum math.
    ref_bf = _reference_bf16(adj, features, params)
    assert jnp.allclose(out, ref_bf, atol=5e-3, rtol=5e-3)
    # Sanity check vs the pure-f32 PyTorch-equivalent math.
    ref_f32 = _reference_f32(adj, features, params)
    assert jnp.allclose(out, ref_f32, atol=5e-2, rtol=5e-2)

    print("KERNEL_OK")
</pallas_src>

<mosaic_0001>
module attributes {stable_mosaic.version = 11 : i64} {
  func.func @_fused_gcn_kernel(%arg0: i32, %arg1: memref<128x128xbf16, #tpu.memory_space<vmem>>, %arg2: memref<128x512xbf16, #tpu.memory_space<vmem>>, %arg3: memref<512x128xbf16, #tpu.memory_space<vmem>>, %arg4: memref<1x128xf32, #tpu.memory_space<vmem>>, %arg5: memref<128x128xbf16, #tpu.memory_space<vmem>>, %arg6: memref<1x128xf32, #tpu.memory_space<vmem>>, %arg7: memref<128x128xf32, #tpu.memory_space<vmem>>, %arg8: memref<128x128xf32, #tpu.memory_space<vmem>>) attributes {dimension_semantics = [#tpu.dimension_semantics<arbitrary>], iteration_bounds = array<i64: 3>, scalar_prefetch = 0 : i64, scratch_operands = 1 : i64, tpu.core_type = #tpu.core_type<tc>, window_params = [{pipeline_mode = #tpu.pipeline_mode<synchronous>, transform_indices = @transform_0, window_bounds = array<i64: 128, 128>}, {transform_indices = @transform_1, window_bounds = array<i64: 128, 512>}, {transform_indices = @transform_2, window_bounds = array<i64: 512, 128>}, {pipeline_mode = #tpu.pipeline_mode<synchronous>, transform_indices = @transform_3, window_bounds = array<i64: 1, 128>}, {pipeline_mode = #tpu.pipeline_mode<synchronous>, transform_indices = @transform_4, window_bounds = array<i64: 128, 128>}, {pipeline_mode = #tpu.pipeline_mode<synchronous>, transform_indices = @transform_5, window_bounds = array<i64: 1, 128>}, {pipeline_mode = #tpu.pipeline_mode<synchronous>, transform_indices = @transform_6, window_bounds = array<i64: 128, 128>}]} {
    %c0_i32 = arith.constant 0 : i32
    %0 = arith.cmpi eq, %arg0, %c0_i32 : i32
    %1 = arith.extui %0 : i1 to i32
    %c0_i32_0 = arith.constant 0 : i32
    %2 = arith.cmpi ne, %1, %c0_i32_0 : i32
    scf.if %2 {
      %cst_9 = arith.constant 0.000000e+00 : f32
      %12 = vector.broadcast %cst_9 : f32 to vector<128x128xf32>
      %c0_10 = arith.constant 0 : index
      %c0_11 = arith.constant 0 : index
      %13 = vector.load %arg8[%c0_10, %c0_11] : memref<128x128xf32, #tpu.memory_space<vmem>>, vector<128x128xf32>
      tpu.vector_store %arg8[%c0_10, %c0_11], %12 {strides = array<i32>} : memref<128x128xf32, #tpu.memory_space<vmem>>, vector<128x128xf32>,
    } else {
    }
    %c0 = arith.constant 0 : index
    %c0_1 = arith.constant 0 : index
    %3 = vector.load %arg8[%c0, %c0_1] : memref<128x128xf32, #tpu.memory_space<vmem>>, vector<128x128xf32>
    %c0_2 = arith.constant 0 : index
    %c0_3 = arith.constant 0 : index
    %4 = vector.load %arg2[%c0_2, %c0_3] : memref<128x512xbf16, #tpu.memory_space<vmem>>, vector<128x512xbf16>
    %c0_4 = arith.constant 0 : index
    %c0_5 = arith.constant 0 : index
    %5 = vector.load %arg3[%c0_4, %c0_5] : memref<512x128xbf16, #tpu.memory_space<vmem>>, vector<512x128xbf16>
    %cst = arith.constant dense<0.000000e+00> : vector<128x128xf32>
    %6 = tpu.matmul %4, %5, %cst {dimension_numbers = #tpu.dot_dimension_numbers<[1], [0], [0], [1], [0, 0, 1, 1], [], []>} : vector<128x512xbf16>, vector<512x128xbf16>, vector<128x128xf32> -> vector<128x128xf32>
    %7 = arith.addf %3, %6 : vector<128x128xf32>
    %c0_6 = arith.constant 0 : index
    %c0_7 = arith.constant 0 : index
    %8 = vector.load %arg8[%c0_6, %c0_7] : memref<128x128xf32, #tpu.memory_space<vmem>>, vector<128x128xf32>
    tpu.vector_store %arg8[%c0_6, %c0_7], %7 {strides = array<i32>} : memref<128x128xf32, #tpu.memory_space<vmem>>, vector<128x128xf32>,
    %c2_i32 = arith.constant 2 : i32
    %9 = arith.cmpi eq, %arg0, %c2_i32 : i32
    %10 = arith.extui %9 : i1 to i32
    %c0_i32_8 = arith.constant 0 : i32
    %11 = arith.cmpi ne, %10, %c0_i32_8 : i32
    scf.if %11 {
      %c0_9 = arith.constant 0 : index
      %c0_10 = arith.constant 0 : index
      %12 = vector.load %arg1[%c0_9, %c0_10] : memref<128x128xbf16, #tpu.memory_space<vmem>>, vector<128x128xbf16>
      %c0_11 = arith.constant 0 : index
      %c0_12 = arith.constant 0 : index
      %13 = vector.load %arg8[%c0_11, %c0_12] : memref<128x128xf32, #tpu.memory_space<vmem>>, vector<128x128xf32>
      %14 = arith.truncf %13 : vector<128x128xf32> to vector<128x128xbf16>
      %cst_13 = arith.constant dense<0.000000e+00> : vector<128x128xf32>
      %15 = tpu.matmul %12, %14, %cst_13 {dimension_numbers = #tpu.dot_dimension_numbers<[1], [0], [0], [1], [0, 0, 1, 1], [], []>} : vector<128x128xbf16>, vector<128x128xbf16>, vector<128x128xf32> -> vector<128x128xf32>
      %c0_14 = arith.constant 0 : index
      %c0_15 = arith.constant 0 : index
      %16 = vector.load %arg4[%c0_14, %c0_15] : memref<1x128xf32, #tpu.memory_space<vmem>>, vector<1x128xf32>
      %17 = vector.broadcast %16 : vector<1x128xf32> to vector<128x128xf32>
      %18 = arith.addf %15, %17 : vector<128x128xf32>
      %cst_16 = arith.constant 0.000000e+00 : f32
      %19 = vector.broadcast %cst_16 : f32 to vector<128x128xf32>
      %20 = arith.maximumf %18, %19 : vector<128x128xf32>
      %21 = arith.truncf %20 : vector<128x128xf32> to vector<128x128xbf16>
      %c0_17 = arith.constant 0 : index
      %c0_18 = arith.constant 0 : index
      %22 = vector.load %arg5[%c0_17, %c0_18] : memref<128x128xbf16, #tpu.memory_space<vmem>>, vector<128x128xbf16>
      %cst_19 = arith.constant dense<0.000000e+00> : vector<128x128xf32>
      %23 = tpu.matmul %21, %22, %cst_19 {dimension_numbers = #tpu.dot_dimension_numbers<[1], [0], [0], [1], [0, 0, 1, 1], [], []>} : vector<128x128xbf16>, vector<128x128xbf16>, vector<128x128xf32> -> vector<128x128xf32>
      %24 = arith.truncf %23 : vector<128x128xf32> to vector<128x128xbf16>
      %cst_20 = arith.constant dense<0.000000e+00> : vector<128x128xf32>
      %25 = tpu.matmul %12, %24, %cst_20 {dimension_numbers = #tpu.dot_dimension_numbers<[1], [0], [0], [1], [0, 0, 1, 1], [], []>} : vector<128x128xbf16>, vector<128x128xbf16>, vector<128x128xf32> -> vector<128x128xf32>
      %c0_21 = arith.constant 0 : index
      %c0_22 = arith.constant 0 : index
      %26 = vector.load %arg6[%c0_21, %c0_22] : memref<1x128xf32, #tpu.memory_space<vmem>>, vector<1x128xf32>
      %27 = vector.broadcast %26 : vector<1x128xf32> to vector<128x128xf32>
      %28 = arith.addf %25, %27 : vector<128x128xf32>
      %c0_23 = arith.constant 0 : index
      %c0_24 = arith.constant 0 : index
      %29 = vector.load %arg7[%c0_23, %c0_24] : memref<128x128xf32, #tpu.memory_space<vmem>>, vector<128x128xf32>
      tpu.vector_store %arg7[%c0_23, %c0_24], %28 {strides = array<i32>} : memref<128x128xf32, #tpu.memory_space<vmem>>, vector<128x128xf32>,
    } else {
    }
    return
  }
  func.func @transform_0(%arg0: i32) -> (i32, i32) {
    %c0_i32 = arith.constant 0 : i32
    %c0_i32_0 = arith.constant 0 : i32
    %c0_i32_1 = arith.constant 0 : i32
    return %c0_i32, %c0_i32_0 : i32, i32
  }
  func.func @transform_1(%arg0: i32) -> (i32, i32) {
    %c0_i32 = arith.constant 0 : i32
    %c0_i32_0 = arith.constant 0 : i32
    return %c0_i32, %arg0 : i32, i32
  }
  func.func @transform_2(%arg0: i32) -> (i32, i32) {
    %c0_i32 = arith.constant 0 : i32
    %c0_i32_0 = arith.constant 0 : i32
    return %arg0, %c0_i32 : i32, i32
  }
  func.func @transform_3(%arg0: i32) -> (i32, i32) {
    %c0_i32 = arith.constant 0 : i32
    %c0_i32_0 = arith.constant 0 : i32
    %c0_i32_1 = arith.constant 0 : i32
    return %c0_i32, %c0_i32_0 : i32, i32
  }
  func.func @transform_4(%arg0: i32) -> (i32, i32) {
    %c0_i32 = arith.constant 0 : i32
    %c0_i32_0 = arith.constant 0 : i32
    %c0_i32_1 = arith.constant 0 : i32
    return %c0_i32, %c0_i32_0 : i32, i32
  }
  func.func @transform_5(%arg0: i32) -> (i32, i32) {
    %c0_i32 = arith.constant 0 : i32
    %c0_i32_0 = arith.constant 0 : i32
    %c0_i32_1 = arith.constant 0 : i32
    return %c0_i32, %c0_i32_0 : i32, i32
  }
  func.func @transform_6(%arg0: i32) -> (i32, i32) {
    %c0_i32 = arith.constant 0 : i32
    %c0_i32_0 = arith.constant 0 : i32
    %c0_i32_1 = arith.constant 0 : i32
    return %c0_i32, %c0_i32_0 : i32, i32
  }
}

</mosaic_0001>

<bundles_post_ra>
// kernel: tpu_custom_call.1
= control target key start
LH: loop header
LB: loop body
LE: loop exit
PB: predicated region body
PF: predicated region fallthrough
CT: control target
= control target key end

     0   :  { %s2574_s0 = inlined_call_operand.hbm [shape: bf16[128,128], index: 0, kind: input, shape index: {}]   ;;  %s2575_s1 = inlined_call_operand.hbm [shape: bf16[128,1536], index: 1, kind: input, shape index: {}]   ;;  %s2576_s2 = inlined_call_operand.hbm [shape: bf16[1536,128], index: 2, kind: input, shape index: {}]   ;;  %s2577_s3 = inlined_call_operand.vmem [shape: f32[1,128], index: 3, kind: input, shape index: {}]   ;;  %s2578_s4 = inlined_call_operand.hbm [shape: bf16[128,128], index: 4, kind: input, shape index: {}]   ;;  %s2579_s5 = inlined_call_operand.vmem [shape: f32[1,128], index: 5, kind: input, shape index: {}]   ;;  %s2580_s6 = inlined_call_operand.hbm [shape: f32[128,128], index: 6, kind: output, shape index: {}]  }
   0x1   :  { %2581 = sst [smem:[#allocation16_spill]] %s2574_s0 }
   0x2   :  { %2582 = sst [smem:[#allocation17_spill]] %s2575_s1 }
   0x3   :  { %11 = vsyncpa [#allocation4], 0 }
   0x4   :  { %12 = vsyncpa [#allocation7], 0 }
   0x5   :  { %14 = vsyncpa [#allocation7 + $0x1], 0 }
   0x6   :  { %15 = vsyncpa [#allocation10], 0 }
   0x7   :  { %16 = vsyncpa [#allocation5], 0  ;;  %s2281_s21 = smov 0   ;;  %s2283_s22 = smov 0  }
   0x8   :  { %s2285_s23 = smov 0   ;;  %s2287_s24 = smov 0  }
   0x9 LB: > { %s2302_s25 = sadd.s32 1, %s2233_s24   ;;  %s50_s26 = sadd.s32 1, %s2229_s23  ;;  %s2233_s24 = sphi %s2287_s24, %s2591_s24   ;;  %s2229_s23 = sphi %s2285_s23, %s2590_s23   ;;  %s2225_s22 = sphi %s2283_s22, %s2589_s22   ;;  %s2221_s21 = sphi %s2281_s21, %s2588_s21  }
   0xa   : > { %s47_s27 = ssub.s32 %s2233_s24, %s2302_s25  ;;  %p57_p0 = scmp.ne.s32.totalorder %s2229_s23, %s2225_s22 }
   0xb   : > { %p48_p1 = scmp.eq.s32.totalorder %s47_s27, 0  ;;  %p58_p2 = scmp.eq.s32.totalorder %s2233_s24, 0 }
   0xc   : > { %p1989_p3 = scmp.lt.s32.totalorder %s2233_s24, 3  ;;  %s231_s29 = sand.u32 1, %s2233_s24  }
   0xd   : > { %s2312_s28 = scalar_select %p48_p1, %s2229_s23, %s50_s26  }
   0xe   : > { %p59_p4 = por %p58_p2, %p57_p0  ;;  %s233_s30 = sand.u32 1, %s2229_s23  }
   0xf   : > { %s2316_s7 = sshll.u32 %s233_s30, 8  ;;  %s1851_s8 = sshll.u32 %s2233_s24, 4 }
  0x10   : > { %s2583_s1 = sld [smem:[#allocation17_spill]]  ;;  %s235_s13 = scalar_lea.vmem [#allocation6], %s2316_s7 }
  0x11   : > { %s243_s14 = sshll.u32 %s235_s13, 4  ;;  %p2325_p5 = pnand %p1989_p3, %p59_p4  ;;  %s244_s14 = int_to_ptr.vmem [resolvable:$true] %s243_s14 }
  0x12   : > { %s2329_s16 = scalar_lea.sflag [#allocation7], %s231_s29 }
  0x13   : > { %p2043_p7 = pneg %p2325_p5 }
  0x16   : > { %s240_s11 = scalar_lea.hbm %s2583_s1, %s1851_s8  ;;  %s2046_s26 = scalar_lea.hbm %s2583_s1, 768 }
  0x17   : > { %s241_s12 = sshll.u32 %s240_s11, 4  ;;  %s242_s12 = int_to_ptr.hbm [resolvable:$true] %s241_s12 }
  0x18   : > { %s2039_s17 = sshra.s32 %s242_s12, 4  ;;  %s2040_s17 = int_to_ptr.hbm [resolvable:$true] %s2039_s17 }
  0x19   : > { %s2041_s18 = scalar_lea.hbm %s2040_s17, 256  ;;  %p2047_p10 = scmp.lt.s32.totalorder %s2040_s17, %s2583_s1 }
  0x1a   : > { %p2042_p6 = scmp.ne.s32.totalorder %s2040_s17, %s2041_s18  ;;  %p2048_p11 = scmp.lt.s32.totalorder %s2046_s26, %s2041_s18 }
  0x1c   : > { %p2044_p8 = pnand %p2043_p7, %p2042_p6  ;;  %p2049_p12 = por %p2048_p11, %p2047_p10 }
  0x1e   : > { %p2045_p9 = pneg %p2044_p8 }
  0x20   : > { %p2050_p13 = pnand %p2049_p12, %p2045_p9 }
  0x22   : > { %2053 = shalt.err (!%p2050_p13)
}
  0x23   : > { %s2235_s29 = smov 768   ;;  %s2236_s8 = smov 256  }
  0x24   : > { %s2237_s9 = smov 16   ;;  %s2346_s10 = sadd.s32 4294967295, %s2233_s24  }
  0x25   : > { %1983 = dma.hbm_to_vmem [thread:$0]  (!%p2325_p5), %s242_s12, 4096, %s244_s14, %s2329_s16, %s2235_s29, %s2236_s8, %s2237_s9  }
  0x26   : > { %p63_p0 = scmp.ne.s32.totalorder %s2225_s22, %s2221_s21  ;;  %p64_p1 = scmp.eq.s32.totalorder %s2346_s10, 0 }
  0x27   : > { %p1510_p2 = scmp.ge.s32.totalorder %s2233_s24, 1  ;;  %p184_p3 = scmp.lt.s32.totalorder %s2233_s24, 4 }
  0x28   : > { %p2355_p4 = por %p64_p1, %p63_p0  ;;  %p1511_p6 = scmp.ne.s32.totalorder %s2346_s10, 0 }
  0x29   : > { %p2360_p8 = pnand %p1510_p2, %p184_p3  ;;  %s2587_s0 = sld [smem:[#allocation16_spill]] }
  0x2a   : > { %s2238_s21 = smov [#allocation3]   ;;  %s212_s26 = sshll.u32 %s2578_s4, 4  ;;  %s213_s26 = int_to_ptr.hbm [resolvable:$true] %s212_s26 }
  0x2b   : > { %p1973_p9 = pneg %p2360_p8  ;;  %s197_s18 = sshll.u32 %s2238_s21, 4  ;;  %s198_s18 = int_to_ptr.vmem [resolvable:$true] %s197_s18 }
  0x2c   : > { %s2239_s27 = smov 64   ;;  %s2240_s30 = smov 4  }
  0x2d   : > { %p1974_p10 = pnand %p1973_p9, %p64_p1  ;;  %s2241_s29 = smov [#allocation9]  }
  0x2e   : > { %s214_s8 = sshll.u32 %s2241_s29, 4  ;;  %s1852_s9 = sshll.u32 %s2233_s24, 8  ;;  %s215_s8 = int_to_ptr.vmem [resolvable:$true] %s214_s8 }
  0x2f   : > { %s195_s17 = sshll.u32 %s2587_s0, 4  ;;  %s262_s21 = scalar_lea.hbm %s2576_s2, %s1852_s9  ;;  %s196_s17 = int_to_ptr.hbm [resolvable:$true] %s195_s17 }
  0x30   : > { %1976 = dma.hbm_to_vmem [thread:$0]  (!%p1974_p10), %s196_s17, 1024, %s198_s18, [#allocation4], %s2239_s27, %s2239_s27, %s2240_s30  }
  0x31   : > { %1979 = dma.hbm_to_vmem [thread:$0]  (!%p1974_p10), %s213_s26, 1024, %s215_s8, [#allocation10], %s2239_s27, %s2239_s27, %s2240_s30  }
  0x32   : > { %s257_s19 = scalar_lea.vmem [#allocation8], %s2316_s7  ;;  %s263_s0 = sshll.u32 %s262_s21, 4  ;;  %s264_s0 = int_to_ptr.hbm [resolvable:$true] %s263_s0 }
  0x33   : > { %s265_s20 = sshll.u32 %s257_s19, 4  ;;  %s2129_s1 = sshra.s32 %s264_s0, 4  ;;  %s266_s20 = int_to_ptr.vmem [resolvable:$true] %s265_s20  ;;  %s2130_s1 = int_to_ptr.hbm [resolvable:$true] %s2129_s1 }
  0x34   : > { %s2131_s17 = scalar_lea.hbm %s2130_s1, 256  ;;  %s2136_s26 = scalar_lea.hbm %s2576_s2, 768 }
  0x35   : > { %p2132_p11 = scmp.ne.s32.totalorder %s2130_s1, %s2131_s17  ;;  %p2137_p0 = scmp.lt.s32.totalorder %s2130_s1, %s2576_s2 }
  0x36   : > { %p2138_p2 = scmp.lt.s32.totalorder %s2136_s26, %s2131_s17 }
  0x37   : > { %p2134_p12 = pnand %p2132_p11, %p2043_p7 }
  0x38   : > { %p2139_p3 = por %p2138_p2, %p2137_p0 }
  0x39   : > { %p2135_p13 = pneg %p2134_p12 }
  0x3b   : > { %p2140_p9 = pnand %p2139_p3, %p2135_p13 }
  0x3d   : > { %2143 = shalt.err (!%p2140_p9)
}
  0x3e   : > { %1986 = dma.hbm_to_vmem [thread:$0]  (!%p2325_p5), %s264_s0, 4096, %s266_s20, %s2329_s16, %s2239_s27, %s2239_s27, %s2240_s30  }
  0x3f   : > { %277 = sbr.rel (%p2360_p8) target bundleno = 1038 (0x40e), region = 44 }
  0x44   : > { %2204 = dma.done.wait (%p64_p1), [#allocation4], 1024  }
  0x45   : > { %2206 = vsyncadd (%p64_p1), [#allocation4], 4294966272  ;;  %s284_s1 = sand.u32 1, %s2346_s10   ;;  %s286_s7 = sand.u32 1, %s2225_s22  }
  0x46   : > { %s1522_s15 = sshll.u32 %s286_s7, 8  ;;  %s285_s9 = scalar_lea.sflag [#allocation7], %s284_s1 }
  0x47   : > { %s2408_s12 = scalar_lea.vmem [#allocation6], %s1522_s15 }
  0x48   : > { %2208 = dma.done.wait (%p2355_p4), %s285_s9, 8192  }
  0x49   : > { %2210 = vsyncadd (%p2355_p4), %s285_s9, 4294959104  ;;  %s2414_s0 = scalar_lea.vmem [#allocation8], %s1522_s15 }
  0x4a   : > { %2212 = dma.done.wait (%p64_p1), [#allocation10], 1024  }
  0x4b   : > { %2214 = vsyncadd (%p64_p1), [#allocation10], 4294966272  ;;  %338 = sbr.rel (%p1511_p6) target bundleno = 97 (0x61), region = 64 }
  0x50   : > { %v2242_v0 = vmov 0.0  }
  0x51   : > { %339 = vst [vmem:[#allocation2 + $0x30] sm:$0xff] %v2242_v0 }
  0x52   : > { %340 = vst [vmem:[#allocation2] sm:$0xff] %v2242_v0 }
  0x53   : > { %341 = vst [vmem:[#allocation2 + $0x58] sm:$0xff] %v2242_v0 }
  0x54   : > { %342 = vst [vmem:[#allocation2 + $0x18] sm:$0xff] %v2242_v0 }
  0x55   : > { %343 = vst [vmem:[#allocation2 + $0x50] sm:$0xff] %v2242_v0 }
  0x56   : > { %344 = vst [vmem:[#allocation2 + $0x68] sm:$0xff] %v2242_v0 }
  0x57   : > { %345 = vst [vmem:[#allocation2 + $0x8] sm:$0xff] %v2242_v0 }
  0x58   : > { %346 = vst [vmem:[#allocation2 + $0x48] sm:$0xff] %v2242_v0 }
  0x59   : > { %347 = vst [vmem:[#allocation2 + $0x40] sm:$0xff] %v2242_v0 }
  0x5a   : > { %348 = vst [vmem:[#allocation2 + $0x20] sm:$0xff] %v2242_v0 }
  0x5b   : > { %349 = vst [vmem:[#allocation2 + $0x10] sm:$0xff] %v2242_v0 }
  0x5c   : > { %350 = vst [vmem:[#allocation2 + $0x38] sm:$0xff] %v2242_v0 }
  0x5d   : > { %351 = vst [vmem:[#allocation2 + $0x60] sm:$0xff] %v2242_v0 }
  0x5e   : > { %352 = vst [vmem:[#allocation2 + $0x70] sm:$0xff] %v2242_v0 }
  0x5f   : > { %353 = vst [vmem:[#allocation2 + $0x78] sm:$0xff] %v2242_v0 }
  0x60   : > { %354 = vst [vmem:[#allocation2 + $0x28] sm:$0xff] %v2242_v0 }
  0x61 PF: > { %v1892_v1 = vld [vmem:[%s2414_s0 + $0x38] sm:$0xff]  ;;  %v1891_v5 = vld [vmem:[%s2414_s0 + $0x30] sm:$0xff]  ;;  %v1890_v9 = vld [vmem:[%s2414_s0 + $0x28] sm:$0xff]  ;;  %p1782_p5 = scmp.ne.s32.totalorder %s2346_s10, 2 }
  0x62   : > { %v1900_v2 = vld [vmem:[%s2414_s0 + $0x78] sm:$0xff]  ;;  %819 = vmatpush.bf16.msra.mxu0 %v1892_v1  ;;  %v1899_v6 = vld [vmem:[%s2414_s0 + $0x70] sm:$0xff]  ;;  %v1898_v10 = vld [vmem:[%s2414_s0 + $0x68] sm:$0xff] }
  0x63   : > { %v1908_v3 = vld [vmem:[%s2414_s0 + $0xb8] sm:$0xff]  ;;  %868 = vmatpush.bf16.msra.mxu1 %v1900_v2  ;;  %v1907_v7 = vld [vmem:[%s2414_s0 + $0xb0] sm:$0xff]  ;;  %v1906_v11 = vld [vmem:[%s2414_s0 + $0xa8] sm:$0xff] }
  0x64   : > { %v1916_v4 = vld [vmem:[%s2414_s0 + $0xf8] sm:$0xff]  ;;  %917 = vmatpush.bf16.msra.mxu2 %v1908_v3  ;;  %v1915_v8 = vld [vmem:[%s2414_s0 + $0xf0] sm:$0xff]  ;;  %v1914_v12 = vld [vmem:[%s2414_s0 + $0xe8] sm:$0xff] }
  0x65   : > { %966 = vmatpush.bf16.msra.mxu3 %v1916_v4  ;;  %v1889_v13 = vld [vmem:[%s2414_s0 + $0x20] sm:$0xff]  ;;  %v1888_v17 = vld [vmem:[%s2414_s0 + $0x18] sm:$0xff]  ;;  %v1887_v21 = vld [vmem:[%s2414_s0 + $0x10] sm:$0xff] }
  0x66   : > { %820 = vmatpush.bf16.msra.mxu0 %v1891_v5  ;;  %v1897_v14 = vld [vmem:[%s2414_s0 + $0x60] sm:$0xff]  ;;  %v1896_v18 = vld [vmem:[%s2414_s0 + $0x58] sm:$0xff]  ;;  %v1895_v22 = vld [vmem:[%s2414_s0 + $0x50] sm:$0xff] }
  0x67   : > { %869 = vmatpush.bf16.msra.mxu1 %v1899_v6  ;;  %v1905_v15 = vld [vmem:[%s2414_s0 + $0xa0] sm:$0xff]  ;;  %v1904_v19 = vld [vmem:[%s2414_s0 + $0x98] sm:$0xff]  ;;  %v1903_v23 = vld [vmem:[%s2414_s0 + $0x90] sm:$0xff] }
  0x68   : > { %918 = vmatpush.bf16.msra.mxu2 %v1907_v7  ;;  %v1913_v16 = vld [vmem:[%s2414_s0 + $0xe0] sm:$0xff]  ;;  %v1912_v20 = vld [vmem:[%s2414_s0 + $0xd8] sm:$0xff]  ;;  %v1911_v24 = vld [vmem:[%s2414_s0 + $0xd0] sm:$0xff] }
  0x69   : > { %967 = vmatpush.bf16.msra.mxu3 %v1915_v8  ;;  %v1886_v25 = vld [vmem:[%s2414_s0 + $0x8] sm:$0xff]  ;;  %v1885_v29 = vld [vmem:[%s2414_s0] sm:$0xff]  ;;  %v1855_v34 = vld [vmem:[%s2408_s12 + $0xc] sm:$0xf0] }
  0x6a   : > { %821 = vmatpush.bf16.msra.mxu0 %v1890_v9  ;;  %v1894_v26 = vld [vmem:[%s2414_s0 + $0x48] sm:$0xff]  ;;  %v1893_v30 = vld [vmem:[%s2414_s0 + $0x40] sm:$0xff]  ;;  %v1530_v36 = vld [vmem:[%s2408_s12 + $0x10] sm:$0xf0] }
  0x6b   : > { %870 = vmatpush.bf16.msra.mxu1 %v1898_v10  ;;  %v1902_v27 = vld [vmem:[%s2414_s0 + $0x88] sm:$0xff]  ;;  %v1901_v31 = vld [vmem:[%s2414_s0 + $0x80] sm:$0xff]  ;;  %v1856_v38 = vld [vmem:[%s2408_s12 + $0x14] sm:$0xf0] }
  0x6c   : > { %919 = vmatpush.bf16.msra.mxu2 %v1906_v11  ;;  %v1910_v28 = vld [vmem:[%s2414_s0 + $0xc8] sm:$0xff]  ;;  %v1909_v32 = vld [vmem:[%s2414_s0 + $0xc0] sm:$0xff]  ;;  %v1538_v40 = vld [vmem:[%s2408_s12 + $0x18] sm:$0xf0] }
  0x6d   : > { %968 = vmatpush.bf16.msra.mxu3 %v1914_v12  ;;  %v1528_v33 = vld [vmem:[%s2408_s12] sm:$0xf]  ;;  %v1853_v35 = vld [vmem:[%s2408_s12 + $0x4] sm:$0xf]  ;;  %v1536_v37 = vld [vmem:[%s2408_s12 + $0x8] sm:$0xf] }
  0x6e   : > { %822 = vmatpush.bf16.msra.mxu0 %v1889_v13  ;;  %v1854_v39 = vld [vmem:[%s2408_s12 + $0xc] sm:$0xf]  ;;  %v1529_v41 = vor.u32 %v1855_v34, %v1528_v33  ;;  %v1533_v42 = vor.u32 %v1853_v35, %v1530_v36  ;;  %v1537_v43 = vor.u32 %v1856_v38, %v1536_v37  ;;  %v1544_v45 = vld [vmem:[%s2408_s12 + $0x20] sm:$0xf]  ;;  %v1859_v46 = vld [vmem:[%s2408_s12 + $0x2c] sm:$0xf0] }
  0x6f   : > { %871 = vmatpush.bf16.msra.mxu1 %v1897_v14  ;;  %v1541_v44 = vor.u32 %v1854_v39, %v1538_v40  ;;  %v1857_v47 = vld [vmem:[%s2408_s12 + $0x24] sm:$0xf]  ;;  %v1546_v48 = vld [vmem:[%s2408_s12 + $0x30] sm:$0xf0]  ;;  %v1552_v49 = vld [vmem:[%s2408_s12 + $0x28] sm:$0xf]  ;;  %v1545_v53 = vor.u32 %v1859_v46, %v1544_v45 }
  0x70   : > { %920 = vmatpush.bf16.msra.mxu2 %v1905_v15  ;;  %v1860_v50 = vld [vmem:[%s2408_s12 + $0x34] sm:$0xf0]  ;;  %v1858_v51 = vld [vmem:[%s2408_s12 + $0x2c] sm:$0xf]  ;;  %v1554_v52 = vld [vmem:[%s2408_s12 + $0x38] sm:$0xf0]  ;;  %v1549_v54 = vor.u32 %v1857_v47, %v1546_v48 }
  0x71   : > { %969 = vmatpush.bf16.msra.mxu3 %v1913_v16  ;;  %v1553_v55 = vor.u32 %v1860_v50, %v1552_v49  ;;  %v1557_v56 = vor.u32 %v1858_v51, %v1554_v52  ;;  %v1560_v57 = vld [vmem:[%s2408_s12 + $0x40] sm:$0xf]  ;;  %v1863_v58 = vld [vmem:[%s2408_s12 + $0x4c] sm:$0xf0]  ;;  %v1861_v59 = vld [vmem:[%s2408_s12 + $0x44] sm:$0xf] }
  0x72   : > { %823 = vmatpush.bf16.msra.mxu0 %v1888_v17  ;;  %v1562_v60 = vld [vmem:[%s2408_s12 + $0x50] sm:$0xf0]  ;;  %v1568_v61 = vld [vmem:[%s2408_s12 + $0x48] sm:$0xf]  ;;  %v1864_v62 = vld [vmem:[%s2408_s12 + $0x54] sm:$0xf0]  ;;  %v1561_v1 = vor.u32 %v1863_v58, %v1560_v57 }
  0x73   : > { %872 = vmatpush.bf16.msra.mxu1 %v1896_v18  ;;  %v1862_v63 = vld [vmem:[%s2408_s12 + $0x4c] sm:$0xf]  ;;  %v1570_v0 = vld [vmem:[%s2408_s12 + $0x58] sm:$0xf0]  ;;  %v1565_v2 = vor.u32 %v1861_v59, %v1562_v60  ;;  %v1569_v3 = vor.u32 %v1864_v62, %v1568_v61  ;;  %v1576_v5 = vld [vmem:[%s2408_s12 + $0x60] sm:$0xf] }
  0x74   : > { %921 = vmatpush.bf16.msra.mxu2 %v1904_v19  ;;  %v1573_v4 = vor.u32 %v1862_v63, %v1570_v0  ;;  %v1867_v6 = vld [vmem:[%s2408_s12 + $0x6c] sm:$0xf0]  ;;  %v1865_v7 = vld [vmem:[%s2408_s12 + $0x64] sm:$0xf]  ;;  %v1578_v8 = vld [vmem:[%s2408_s12 + $0x70] sm:$0xf0] }
  0x75   : > { %970 = vmatpush.bf16.msra.mxu3 %v1912_v20  ;;  %v1584_v9 = vld [vmem:[%s2408_s12 + $0x68] sm:$0xf]  ;;  %v1868_v10 = vld [vmem:[%s2408_s12 + $0x74] sm:$0xf0]  ;;  %v1866_v11 = vld [vmem:[%s2408_s12 + $0x6c] sm:$0xf]  ;;  %v1577_v13 = vor.u32 %v1867_v6, %v1576_v5  ;;  %v1581_v14 = vor.u32 %v1865_v7, %v1578_v8 }
  0x76   : > { %824 = vmatpush.bf16.msra.mxu0 %v1887_v21  ;;  %v1586_v12 = vld [vmem:[%s2408_s12 + $0x78] sm:$0xf0]  ;;  %v1585_v15 = vor.u32 %v1868_v10, %v1584_v9  ;;  %v1592_v17 = vld [vmem:[%s2408_s12 + $0x80] sm:$0xf]  ;;  %v1871_v18 = vld [vmem:[%s2408_s12 + $0x8c] sm:$0xf0] }
  0x77   : > { %873 = vmatpush.bf16.msra.mxu1 %v1895_v22  ;;  %v1589_v16 = vor.u32 %v1866_v11, %v1586_v12  ;;  %v1869_v19 = vld [vmem:[%s2408_s12 + $0x84] sm:$0xf]  ;;  %v1594_v20 = vld [vmem:[%s2408_s12 + $0x90] sm:$0xf0]  ;;  %v1600_v21 = vld [vmem:[%s2408_s12 + $0x88] sm:$0xf] }
  0x78   : > { %922 = vmatpush.bf16.msra.mxu2 %v1903_v23  ;;  %v1872_v22 = vld [vmem:[%s2408_s12 + $0x94] sm:$0xf0]  ;;  %v1870_v23 = vld [vmem:[%s2408_s12 + $0x8c] sm:$0xf]  ;;  %v1616_v33 = vld [vmem:[%s2408_s12 + $0xa8] sm:$0xf] }
  0x79   : > { %971 = vmatpush.bf16.msra.mxu3 %v1911_v24  ;;  %v1602_v24 = vld [vmem:[%s2408_s12 + $0x98] sm:$0xf0]  ;;  %v1876_v34 = vld [vmem:[%s2408_s12 + $0xb4] sm:$0xf0]  ;;  %v1874_v35 = vld [vmem:[%s2408_s12 + $0xac] sm:$0xf] }
  0x7a   : > { %825 = vmatpush.bf16.msra.mxu0 %v1886_v25  ;;  %v1593_v25 = vor.u32 %v1871_v18, %v1592_v17  ;;  %v1618_v36 = vld [vmem:[%s2408_s12 + $0xb8] sm:$0xf0]  ;;  %v1617_v39 = vor.u32 %v1876_v34, %v1616_v33  ;;  %v1632_v45 = vld [vmem:[%s2408_s12 + $0xc8] sm:$0xf]  ;;  %v1880_v46 = vld [vmem:[%s2408_s12 + $0xd4] sm:$0xf0] }
  0x7b   : > { %874 = vmatpush.bf16.msra.mxu1 %v1894_v26  ;;  %v1597_v26 = vor.u32 %v1869_v19, %v1594_v20  ;;  %v1621_v40 = vor.u32 %v1874_v35, %v1618_v36  ;;  %v1878_v47 = vld [vmem:[%s2408_s12 + $0xcc] sm:$0xf]  ;;  %v1634_v48 = vld [vmem:[%s2408_s12 + $0xd8] sm:$0xf0]  ;;  %v1633_v51 = vor.u32 %v1880_v46, %v1632_v45  ;;  %v1648_v57 = vld [vmem:[%s2408_s12 + $0xe8] sm:$0xf] }
  0x7c   : > { %923 = vmatpush.bf16.msra.mxu2 %v1902_v27  ;;  %v1601_v27 = vor.u32 %v1872_v22, %v1600_v21  ;;  %v1637_v52 = vor.u32 %v1878_v47, %v1634_v48  ;;  %v1884_v58 = vld [vmem:[%s2408_s12 + $0xf4] sm:$0xf0]  ;;  %v1882_v59 = vld [vmem:[%s2408_s12 + $0xec] sm:$0xf]  ;;  %v1650_v60 = vld [vmem:[%s2408_s12 + $0xf8] sm:$0xf0] }
  0x7d   : > { %972 = vmatpush.bf16.msra.mxu3 %v1910_v28  ;;  %v1605_v28 = vor.u32 %v1870_v23, %v1602_v24  ;;  %v1649_v63 = vor.u32 %v1884_v58, %v1648_v57  ;;  %v1653_v0 = vor.u32 %v1882_v59, %v1650_v60  ;;  %v355_v9 = vld [vmem:[#allocation2 + $0x30] sm:$0xff]  ;;  %v356_v18 = vld [vmem:[#allocation2] sm:$0xff]  ;;  %v358_v36 = vld [vmem:[#allocation2 + $0x18] sm:$0xff] }
  0x7e   : > { %826 = vmatpush.bf16.msra.mxu0 %v1885_v29  ;;  %v1608_v29 = vld [vmem:[%s2408_s12 + $0xa0] sm:$0xf]  ;;  %v359_v45 = vld [vmem:[#allocation2 + $0x50] sm:$0xff] }
  0x7f   : > { %875 = vmatpush.bf16.msra.mxu1 %v1893_v30  ;;  %v1875_v30 = vld [vmem:[%s2408_s12 + $0xac] sm:$0xf0] }
  0x80   : > { %924 = vmatpush.bf16.msra.mxu2 %v1901_v31  ;;  %v1873_v31 = vld [vmem:[%s2408_s12 + $0xa4] sm:$0xf]  ;;  %v1609_v37 = vor.u32 %v1875_v30, %v1608_v29 }
  0x81   : > { %973 = vmatpush.bf16.msra.mxu3 %v1909_v32  ;;  %827 = vmatmul.bf16.vlgmr.msra.gmra.mxu0 %v1529_v41  ;;  %v1610_v32 = vld [vmem:[%s2408_s12 + $0xb0] sm:$0xf0]  ;;  %v1624_v41 = vld [vmem:[%s2408_s12 + $0xc0] sm:$0xf] }
  0x82   : > { %876 = vmatmul.bf16.vlgmr.msra.gmra.mxu1 %v1533_v42  ;;  %v1613_v38 = vor.u32 %v1873_v31, %v1610_v32  ;;  %v1879_v42 = vld [vmem:[%s2408_s12 + $0xcc] sm:$0xf0] }
  0x83   : > { %925 = vmatmul.bf16.vlgmr.msra.gmra.mxu2 %v1537_v43  ;;  %v1877_v43 = vld [vmem:[%s2408_s12 + $0xc4] sm:$0xf]  ;;  %v1625_v49 = vor.u32 %v1879_v42, %v1624_v41 }
  0x84   : > { %974 = vmatmul.bf16.vlgmr.msra.gmra.mxu3 %v1541_v44  ;;  %v1626_v44 = vld [vmem:[%s2408_s12 + $0xd0] sm:$0xf0] }
  0x85   : > { %v1629_v50 = vor.u32 %v1877_v43, %v1626_v44 }
  0x91   : > { %832 = vmatmul.bf16.gmra.mxu0 %v1545_v53  ;;  %v1640_v53 = vld [vmem:[%s2408_s12 + $0xe0] sm:$0xf] }
  0x92   : > { %881 = vmatmul.bf16.gmra.mxu1 %v1549_v54  ;;  %v1883_v54 = vld [vmem:[%s2408_s12 + $0xec] sm:$0xf0] }
  0x93   : > { %930 = vmatmul.bf16.gmra.mxu2 %v1553_v55  ;;  %v1881_v55 = vld [vmem:[%s2408_s12 + $0xe4] sm:$0xf]  ;;  %v1641_v61 = vor.u32 %v1883_v54, %v1640_v53  ;;  %v360_v54 = vld [vmem:[#allocation2 + $0x68] sm:$0xff] }
  0x94   : > { %979 = vmatmul.bf16.gmra.mxu3 %v1557_v56  ;;  %v1642_v56 = vld [vmem:[%s2408_s12 + $0xf0] sm:$0xf0] }
  0x95   : > { %v1645_v62 = vor.u32 %v1881_v55, %v1642_v56 }
  0xa1   : > { %837 = vmatmul.bf16.gmra.mxu0 %v1561_v1 }
  0xa2   : > { %886 = vmatmul.bf16.gmra.mxu1 %v1565_v2 }
  0xa3   : > { %935 = vmatmul.bf16.gmra.mxu2 %v1569_v3 }
  0xa4   : > { %984 = vmatmul.bf16.gmra.mxu3 %v1573_v4 }
  0xb1   : > { %842 = vmatmul.bf16.gmra.mxu0 %v1577_v13 }
  0xb2   : > { %891 = vmatmul.bf16.gmra.mxu1 %v1581_v14 }
  0xb3   : > { %940 = vmatmul.bf16.gmra.mxu2 %v1585_v15 }
  0xb4   : > { %989 = vmatmul.bf16.gmra.mxu3 %v1589_v16 }
  0xc1   : > { %847 = vmatmul.bf16.gmra.mxu0 %v1593_v25 }
  0xc2   : > { %896 = vmatmul.bf16.gmra.mxu1 %v1597_v26 }
  0xc3   : > { %945 = vmatmul.bf16.gmra.mxu2 %v1601_v27  ;;  %v357_v27 = vld [vmem:[#allocation2 + $0x58] sm:$0xff] }
  0xc4   : > { %994 = vmatmul.bf16.gmra.mxu3 %v1605_v28 }
  0xd1   : > { %852 = vmatmul.bf16.gmra.mxu0 %v1609_v37 }
  0xd2   : > { %901 = vmatmul.bf16.gmra.mxu1 %v1613_v38 }
  0xd3   : > { %950 = vmatmul.bf16.gmra.mxu2 %v1617_v39 }
  0xd4   : > { %999 = vmatmul.bf16.gmra.mxu3 %v1621_v40 }
  0xe1   : > { %857 = vmatmul.bf16.gmra.mxu0 %v1625_v49 }
  0xe2   : > { %906 = vmatmul.bf16.gmra.mxu1 %v1629_v50 }
  0xe3   : > { %955 = vmatmul.bf16.gmra.mxu2 %v1633_v51 }
  0xe4   : > { %1004 = vmatmul.bf16.gmra.mxu3 %v1637_v52 }
  0xf1   : > { %862 = vmatmul.bf16.gmra.mxu0 %v1641_v61 }
  0xf2   : > { %911 = vmatmul.bf16.gmra.mxu1 %v1645_v62 }
  0xf3   : > { %960 = vmatmul.bf16.gmra.mxu2 %v1649_v63  ;;  %v361_v63 = vld [vmem:[#allocation2 + $0x8] sm:$0xff] }
  0xf4   : > { %1009 = vmatmul.bf16.gmra.mxu3 %v1653_v0 }
  0xfe   : > { %v828_v1 = vpop.f32.mrf.mxu0 }
  0xff   : > { %v877_v2 = vpop.f32.mrf.mxu1 }
 0x100   : > { %v878_v3 = vadd.f32 %v877_v2, %v828_v1 }
 0x106   : > { %v926_v4 = vpop.f32.mrf.mxu2  ;;  %v830_v7 = vpop.f32.mrf.mxu0 }
 0x107   : > { %v975_v5 = vpop.f32.mrf.mxu3  ;;  %v927_v6 = vadd.f32 %v926_v4, %v878_v3  ;;  %v879_v8 = vpop.f32.mrf.mxu1 }
 0x108   : > { %v880_v12 = vadd.f32 %v879_v8, %v830_v7  ;;  %v362_v8 = vld [vmem:[#allocation2 + $0x48] sm:$0xff] }
 0x109   : > { %v976_v10 = vadd.f32 %v975_v5, %v927_v6 }
 0x10b   : > { %v1015_v11 = vadd.f32 %v976_v10, %v355_v9 }
 0x10d   : > { %1031 = vst [vmem:[#allocation2 + $0x30] sm:$0xff] %v1015_v11 }
 0x10e   : > { %v928_v13 = vpop.f32.mrf.mxu2  ;;  %v833_v16 = vpop.f32.mrf.mxu0 }
 0x10f   : > { %v977_v14 = vpop.f32.mrf.mxu3  ;;  %v929_v15 = vadd.f32 %v928_v13, %v880_v12  ;;  %v882_v17 = vpop.f32.mrf.mxu1 }
 0x110   : > { %v883_v21 = vadd.f32 %v882_v17, %v833_v16  ;;  %v363_v17 = vld [vmem:[#allocation2 + $0x40] sm:$0xff] }
 0x111   : > { %v978_v19 = vadd.f32 %v977_v14, %v929_v15 }
 0x113   : > { %v1016_v20 = vadd.f32 %v978_v19, %v356_v18 }
 0x115   : > { %1032 = vst [vmem:[#allocation2] sm:$0xff] %v1016_v20 }
 0x116   : > { %v931_v22 = vpop.f32.mrf.mxu2  ;;  %v835_v25 = vpop.f32.mrf.mxu0 }
 0x117   : > { %v980_v23 = vpop.f32.mrf.mxu3  ;;  %v932_v24 = vadd.f32 %v931_v22, %v883_v21  ;;  %v884_v26 = vpop.f32.mrf.mxu1 }
 0x118   : > { %v885_v30 = vadd.f32 %v884_v26, %v835_v25  ;;  %v364_v26 = vld [vmem:[#allocation2 + $0x20] sm:$0xff] }
 0x119   : > { %v981_v28 = vadd.f32 %v980_v23, %v932_v24 }
 0x11b   : > { %v1017_v29 = vadd.f32 %v981_v28, %v357_v27 }
 0x11d   : > { %1033 = vst [vmem:[#allocation2 + $0x58] sm:$0xff] %v1017_v29 }
 0x11e   : > { %v933_v31 = vpop.f32.mrf.mxu2  ;;  %v838_v34 = vpop.f32.mrf.mxu0 }
 0x11f   : > { %v982_v32 = vpop.f32.mrf.mxu3  ;;  %v934_v33 = vadd.f32 %v933_v31, %v885_v30  ;;  %v887_v35 = vpop.f32.mrf.mxu1 }
 0x120   : > { %v888_v39 = vadd.f32 %v887_v35, %v838_v34  ;;  %v365_v35 = vld [vmem:[#allocation2 + $0x10] sm:$0xff] }
 0x121   : > { %v983_v37 = vadd.f32 %v982_v32, %v934_v33 }
 0x123   : > { %v1018_v38 = vadd.f32 %v983_v37, %v358_v36 }
 0x125   : > { %1034 = vst [vmem:[#allocation2 + $0x18] sm:$0xff] %v1018_v38 }
 0x126   : > { %v936_v40 = vpop.f32.mrf.mxu2  ;;  %v840_v43 = vpop.f32.mrf.mxu0 }
 0x127   : > { %v985_v41 = vpop.f32.mrf.mxu3  ;;  %v937_v42 = vadd.f32 %v936_v40, %v888_v39  ;;  %v889_v44 = vpop.f32.mrf.mxu1 }
 0x128   : > { %v890_v48 = vadd.f32 %v889_v44, %v840_v43  ;;  %v366_v44 = vld [vmem:[#allocation2 + $0x38] sm:$0xff] }
 0x129   : > { %v986_v46 = vadd.f32 %v985_v41, %v937_v42 }
 0x12b   : > { %v1019_v47 = vadd.f32 %v986_v46, %v359_v45 }
 0x12d   : > { %1035 = vst [vmem:[#allocation2 + $0x50] sm:$0xff] %v1019_v47 }
 0x12e   : > { %v938_v49 = vpop.f32.mrf.mxu2  ;;  %v843_v52 = vpop.f32.mrf.mxu0 }
 0x12f   : > { %v987_v50 = vpop.f32.mrf.mxu3  ;;  %v939_v51 = vadd.f32 %v938_v49, %v890_v48  ;;  %v892_v53 = vpop.f32.mrf.mxu1 }
 0x130   : > { %v893_v57 = vadd.f32 %v892_v53, %v843_v52  ;;  %v367_v53 = vld [vmem:[#allocation2 + $0x60] sm:$0xff] }
 0x131   : > { %v988_v55 = vadd.f32 %v987_v50, %v939_v51 }
 0x133   : > { %v1020_v56 = vadd.f32 %v988_v55, %v360_v54 }
 0x135   : > { %1036 = vst [vmem:[#allocation2 + $0x68] sm:$0xff] %v1020_v56 }
 0x136   : > { %v941_v58 = vpop.f32.mrf.mxu2  ;;  %v845_v61 = vpop.f32.mrf.mxu0 }
 0x137   : > { %v990_v59 = vpop.f32.mrf.mxu3  ;;  %v942_v60 = vadd.f32 %v941_v58, %v893_v57  ;;  %v894_v62 = vpop.f32.mrf.mxu1 }
 0x138   : > { %v895_v2 = vadd.f32 %v894_v62, %v845_v61 }
 0x139   : > { %v991_v0 = vadd.f32 %v990_v59, %v942_v60  ;;  %v368_v60 = vld [vmem:[#allocation2 + $0x70] sm:$0xff] }
 0x13b   : > { %v1021_v1 = vadd.f32 %v991_v0, %v361_v63 }
 0x13d   : > { %1037 = vst [vmem:[#allocation2 + $0x8] sm:$0xff] %v1021_v1 }
 0x13e   : > { %v943_v3 = vpop.f32.mrf.mxu2  ;;  %v848_v6 = vpop.f32.mrf.mxu0 }
 0x13f   : > { %v992_v4 = vpop.f32.mrf.mxu3  ;;  %v944_v5 = vadd.f32 %v943_v3, %v895_v2  ;;  %v897_v7 = vpop.f32.mrf.mxu1 }
 0x140   : > { %v898_v11 = vadd.f32 %v897_v7, %v848_v6 }
 0x141   : > { %v993_v9 = vadd.f32 %v992_v4, %v944_v5  ;;  %v369_v5 = vld [vmem:[#allocation2 + $0x78] sm:$0xff] }
 0x143   : > { %v1022_v10 = vadd.f32 %v993_v9, %v362_v8 }
 0x145   : > { %1038 = vst [vmem:[#allocation2 + $0x48] sm:$0xff] %v1022_v10 }
 0x146   : > { %v946_v12 = vpop.f32.mrf.mxu2  ;;  %v850_v15 = vpop.f32.mrf.mxu0 }
 0x147   : > { %v995_v13 = vpop.f32.mrf.mxu3  ;;  %v947_v14 = vadd.f32 %v946_v12, %v898_v11  ;;  %v899_v16 = vpop.f32.mrf.mxu1 }
 0x148   : > { %v900_v20 = vadd.f32 %v899_v16, %v850_v15 }
 0x149   : > { %v996_v18 = vadd.f32 %v995_v13, %v947_v14  ;;  %v370_v13 = vld [vmem:[#allocation2 + $0x28] sm:$0xff] }
 0x14b   : > { %v1023_v19 = vadd.f32 %v996_v18, %v363_v17 }
 0x14d   : > { %1039 = vst [vmem:[#allocation2 + $0x40] sm:$0xff] %v1023_v19 }
 0x14e   : > { %v948_v21 = vpop.f32.mrf.mxu2  ;;  %v853_v24 = vpop.f32.mrf.mxu0 }
 0x14f   : > { %v997_v22 = vpop.f32.mrf.mxu3  ;;  %v949_v23 = vadd.f32 %v948_v21, %v900_v20  ;;  %v902_v25 = vpop.f32.mrf.mxu1 }
 0x150   : > { %v903_v29 = vadd.f32 %v902_v25, %v853_v24 }
 0x151   : > { %v998_v27 = vadd.f32 %v997_v22, %v949_v23 }
 0x153   : > { %v1024_v28 = vadd.f32 %v998_v27, %v364_v26 }
 0x155   : > { %1040 = vst [vmem:[#allocation2 + $0x20] sm:$0xff] %v1024_v28 }
 0x156   : > { %v951_v30 = vpop.f32.mrf.mxu2  ;;  %v855_v33 = vpop.f32.mrf.mxu0 }
 0x157   : > { %v1000_v31 = vpop.f32.mrf.mxu3  ;;  %v952_v32 = vadd.f32 %v951_v30, %v903_v29  ;;  %v904_v34 = vpop.f32.mrf.mxu1 }
 0x158   : > { %v905_v38 = vadd.f32 %v904_v34, %v855_v33 }
 0x159   : > { %v1001_v36 = vadd.f32 %v1000_v31, %v952_v32 }
 0x15b   : > { %v1025_v37 = vadd.f32 %v1001_v36, %v365_v35 }
 0x15d   : > { %1041 = vst [vmem:[#allocation2 + $0x10] sm:$0xff] %v1025_v37 }
 0x15e   : > { %v953_v39 = vpop.f32.mrf.mxu2  ;;  %v858_v42 = vpop.f32.mrf.mxu0 }
 0x15f   : > { %v1002_v40 = vpop.f32.mrf.mxu3  ;;  %v954_v41 = vadd.f32 %v953_v39, %v905_v38  ;;  %v907_v43 = vpop.f32.mrf.mxu1 }
 0x160   : > { %v908_v47 = vadd.f32 %v907_v43, %v858_v42 }
 0x161   : > { %v1003_v45 = vadd.f32 %v1002_v40, %v954_v41 }
 0x163   : > { %v1026_v46 = vadd.f32 %v1003_v45, %v366_v44 }
 0x165   : > { %1042 = vst [vmem:[#allocation2 + $0x38] sm:$0xff] %v1026_v46 }
 0x166   : > { %v956_v48 = vpop.f32.mrf.mxu2  ;;  %v860_v51 = vpop.f32.mrf.mxu0 }
 0x167   : > { %v1005_v49 = vpop.f32.mrf.mxu3  ;;  %v957_v50 = vadd.f32 %v956_v48, %v908_v47  ;;  %v909_v52 = vpop.f32.mrf.mxu1 }
 0x168   : > { %v910_v56 = vadd.f32 %v909_v52, %v860_v51 }
 0x169   : > { %v1006_v54 = vadd.f32 %v1005_v49, %v957_v50 }
 0x16b   : > { %v1027_v55 = vadd.f32 %v1006_v54, %v367_v53 }
 0x16d   : > { %1043 = vst [vmem:[#allocation2 + $0x60] sm:$0xff] %v1027_v55 }
 0x16e   : > { %v958_v57 = vpop.f32.mrf.mxu2  ;;  %v863_v61 = vpop.f32.mrf.mxu0 }
 0x16f   : > { %v1007_v58 = vpop.f32.mrf.mxu3  ;;  %v959_v59 = vadd.f32 %v958_v57, %v910_v56  ;;  %v912_v62 = vpop.f32.mrf.mxu1 }
 0x170   : > { %v913_v1 = vadd.f32 %v912_v62, %v863_v61 }
 0x171   : > { %v1008_v63 = vadd.f32 %v1007_v58, %v959_v59 }
 0x173   : > { %v1028_v0 = vadd.f32 %v1008_v63, %v368_v60 }
 0x175   : > { %1044 = vst [vmem:[#allocation2 + $0x70] sm:$0xff] %v1028_v0 }
 0x176   : > { %v961_v2 = vpop.f32.mrf.mxu2  ;;  %v865_v7 = vpop.f32.mrf.mxu0 }
 0x177   : > { %v1010_v3 = vpop.f32.mrf.mxu3  ;;  %v962_v4 = vadd.f32 %v961_v2, %v913_v1  ;;  %v914_v8 = vpop.f32.mrf.mxu1 }
 0x178   : > { %v915_v10 = vadd.f32 %v914_v8, %v865_v7 }
 0x179   : > { %v1011_v6 = vadd.f32 %v1010_v3, %v962_v4 }
 0x17b   : > { %v1029_v9 = vadd.f32 %v1011_v6, %v369_v5 }
 0x17d   : > { %1045 = vst [vmem:[#allocation2 + $0x78] sm:$0xff] %v1029_v9 }
 0x17e   : > { %v963_v11 = vpop.f32.mrf.mxu2 }
 0x17f   : > { %v964_v12 = vadd.f32 %v963_v11, %v915_v10  ;;  %v1012_v14 = vpop.f32.mrf.mxu3 }
 0x181   : > { %v1013_v15 = vadd.f32 %v1012_v14, %v964_v12  ;;  %1050 = sbr.rel (%p1782_p5) target bundleno = 1032 (0x408), region = 68 }
 0x183   : > { %v1030_v16 = vadd.f32 %v1013_v15, %v370_v13 }
 0x185   : > { %1046 = vst [vmem:[#allocation2 + $0x28] sm:$0xff] %v1030_v16 }
 0x186   : > { %v1081_v17 = vld [vmem:[#allocation2 + $0x78] sm:$0xff]  ;;  %v1079_v19 = vld [vmem:[#allocation2 + $0x60] sm:$0xff]  ;;  %v1080_v21 = vld [vmem:[#allocation2 + $0x70] sm:$0xff] }
 0x187   : > { %v1089_v22 = vpack.c.bf16 %v1080_v21, %v1079_v19  ;;  %v1077_v23 = vld [vmem:[#allocation2 + $0x10] sm:$0xff]  ;;  %v1078_v24 = vld [vmem:[#allocation2 + $0x38] sm:$0xff]  ;;  %v1075_v26 = vld [vmem:[#allocation2 + $0x40] sm:$0xff] }
 0x188   : > { %v1088_v25 = vpack.c.bf16 %v1078_v24, %v1077_v23  ;;  %v1076_v27 = vld [vmem:[#allocation2 + $0x20] sm:$0xff]  ;;  %v1073_v29 = vld [vmem:[#allocation2 + $0x8] sm:$0xff]  ;;  %v1071_v32 = vld [vmem:[#allocation2 + $0x50] sm:$0xff] }
 0x189   : > { %v1087_v28 = vpack.c.bf16 %v1076_v27, %v1075_v26  ;;  %v1074_v30 = vld [vmem:[#allocation2 + $0x48] sm:$0xff]  ;;  %v1069_v35 = vld [vmem:[#allocation2 + $0x58] sm:$0xff]  ;;  %v1067_v38 = vld [vmem:[#allocation2 + $0x30] sm:$0xff] }
 0x18a   : > { %v1086_v31 = vpack.c.bf16 %v1074_v30, %v1073_v29  ;;  %v1072_v33 = vld [vmem:[#allocation2 + $0x68] sm:$0xff]  ;;  %v1070_v36 = vld [vmem:[#allocation2 + $0x18] sm:$0xff]  ;;  %v1068_v39 = vld [vmem:[#allocation2] sm:$0xff] }
 0x18b   : > { %v1085_v34 = vpack.c.bf16 %v1072_v33, %v1071_v32  ;;  %v1084_v37 = vpack.c.bf16 %v1070_v36, %v1069_v35  ;;  %v1083_v40 = vpack.c.bf16 %v1068_v39, %v1067_v38  ;;  %v2519_v41 = vld [vmem:[#allocation3] sm:$0xff]  ;;  %v2521_v42 = vld [vmem:[#allocation3 + $0x30] sm:$0xff]  ;;  %v2525_v43 = vld [vmem:[#allocation3 + $0x8] sm:$0xff] }
 0x18c   : > { %v1082_v18 = vld [vmem:[#allocation2 + $0x28] sm:$0xff]  ;;  %v2527_v44 = vld [vmem:[#allocation3 + $0x38] sm:$0xff]  ;;  %v2531_v45 = vld [vmem:[#allocation3 + $0x10] sm:$0xff] }
 0x18d   : > { %v1090_v20 = vpack.c.bf16 %v1082_v18, %v1081_v17  ;;  %v2534_v46 = vld [vmem:[#allocation3 + $0x18] sm:$0xff]  ;;  %v1931_v48 = vld [vmem:[#allocation9 + $0x30] sm:$0xff]  ;;  %v1930_v49 = vld [vmem:[#allocation9 + $0x28] sm:$0xff] }
 0x18e   : > { %v1932_v47 = vld [vmem:[#allocation9 + $0x38] sm:$0xff]  ;;  %v1929_v50 = vld [vmem:[#allocation9 + $0x20] sm:$0xff]  ;;  %v2540_v52 = vld [vmem:[#allocation3 + $0x28] sm:$0xff] }
 0x18f   : > { %1143 = vmatpush.bf16.msra.mxu0 %v1090_v20  ;;  %1933 = vmatpush.bf16.msra.mxu3 %v1090_v20  ;;  %v2537_v51 = vld [vmem:[#allocation3 + $0x20] sm:$0xff]  ;;  %v1928_v53 = vld [vmem:[#allocation9 + $0x18] sm:$0xff]  ;;  %v1927_v54 = vld [vmem:[#allocation9 + $0x10] sm:$0xff] }
 0x190   : > { %1280 = vmatpush.bf16.msra.mxu1 %v1932_v47  ;;  %v1926_v55 = vld [vmem:[#allocation9 + $0x8] sm:$0xff]  ;;  %v1925_v56 = vld [vmem:[#allocation9] sm:$0xff] }
 0x191   : > { %v2037_v58 = vld [vmem:[%s2577_s3] ss:$0 sm:$0xff] }
 0x193   : > { %1144 = vmatpush.bf16.msra.mxu0 %v1089_v22  ;;  %1934 = vmatpush.bf16.msra.mxu3 %v1089_v22 }
 0x194   : > { %1281 = vmatpush.bf16.msra.mxu1 %v1931_v48 }
 0x197   : > { %1145 = vmatpush.bf16.msra.mxu0 %v1088_v25  ;;  %1935 = vmatpush.bf16.msra.mxu3 %v1088_v25 }
 0x198   : > { %1282 = vmatpush.bf16.msra.mxu1 %v1930_v49 }
 0x19b   : > { %1146 = vmatpush.bf16.msra.mxu0 %v1087_v28  ;;  %1936 = vmatpush.bf16.msra.mxu3 %v1087_v28 }
 0x19c   : > { %1283 = vmatpush.bf16.msra.mxu1 %v1929_v50 }
 0x19f   : > { %1147 = vmatpush.bf16.msra.mxu0 %v1086_v31  ;;  %1937 = vmatpush.bf16.msra.mxu3 %v1086_v31 }
 0x1a0   : > { %1284 = vmatpush.bf16.msra.mxu1 %v1928_v53 }
 0x1a3   : > { %1148 = vmatpush.bf16.msra.mxu0 %v1085_v34  ;;  %1938 = vmatpush.bf16.msra.mxu3 %v1085_v34 }
 0x1a4   : > { %1285 = vmatpush.bf16.msra.mxu1 %v1927_v54 }
 0x1a7   : > { %1149 = vmatpush.bf16.msra.mxu0 %v1084_v37  ;;  %1939 = vmatpush.bf16.msra.mxu3 %v1084_v37 }
 0x1a8   : > { %1286 = vmatpush.bf16.msra.mxu1 %v1926_v55 }
 0x1ab   : > { %1150 = vmatpush.bf16.msra.mxu0 %v1083_v40  ;;  %1940 = vmatpush.bf16.msra.mxu3 %v1083_v40 }
 0x1ac   : > { %1287 = vmatpush.bf16.msra.mxu1 %v1925_v56 }
 0x1ae   : > { %1151 = vmatmul.bf16.vlgmr.msra.gmra.mxu0 %v2519_v41  ;;  %1181 = vmatmul.bf16.vlgmr.msra.gmra.mxu3 %v2521_v42 }
 0x1af   : > { %1941 = vmatpush.bf16.msrb.mxu3 %v1932_v47 }
 0x1b3   : > { %1942 = vmatpush.bf16.msrb.mxu3 %v1931_v48 }
 0x1b7   : > { %1943 = vmatpush.bf16.msrb.mxu3 %v1930_v49 }
 0x1bb   : > { %1944 = vmatpush.bf16.msrb.mxu3 %v1929_v50 }
 0x1be   : > { %1156 = vmatmul.bf16.gmra.mxu0 %v2525_v43  ;;  %1186 = vmatmul.bf16.gmra.mxu3 %v2527_v44 }
 0x1bf   : > { %1945 = vmatpush.bf16.msrb.mxu3 %v1928_v53 }
 0x1c3   : > { %1946 = vmatpush.bf16.msrb.mxu3 %v1927_v54 }
 0x1c7   : > { %1947 = vmatpush.bf16.msrb.mxu3 %v1926_v55 }
 0x1cb   : > { %1948 = vmatpush.bf16.msrb.mxu3 %v1925_v56 }
 0x1ce   : > { %1161 = vmatmul.bf16.gmra.mxu0 %v2531_v45 }
 0x1de   : > { %1166 = vmatmul.bf16.gmra.mxu0 %v2534_v46 }
 0x1ee   : > { %1171 = vmatmul.bf16.gmra.mxu0 %v2537_v51 }
 0x1fe   : > { %1176 = vmatmul.bf16.gmra.mxu0 %v2540_v52 }
 0x22b   : > { %v1152_v57 = vpop.f32.mrf.mxu0 }
 0x22c   : > { %v1153_v60 = vadd.f32 %v2037_v58, %v1152_v57 }
 0x22e   : > { %v1192_v63 = vmax.f32 %v1153_v60, 0.0 }
 0x231   : > { %v1182_v59 = vpop.f32.mrf.mxu3 }
 0x232   : > { %v1183_v1 = vadd.f32 %v2037_v58, %v1182_v59 }
 0x233   : > { %v1154_v61 = vpop.f32.mrf.mxu0 }
 0x234   : > { %v1155_v62 = vadd.f32 %v2037_v58, %v1154_v61  ;;  %v1204_v4 = vmax.f32 %v1183_v1, 0.0 }
 0x236   : > { %v1193_v0 = vmax.f32 %v1155_v62, 0.0 }
 0x238   : > { %v1208_v2 = vpack.c.bf16 %v1193_v0, %v1192_v63 }
 0x239   : > { %v1184_v3 = vpop.f32.mrf.mxu3 }
 0x23a   : > { %1288 = vmatmul.bf16.vlgmr.msra.gmra.mxu1 %v1208_v2  ;;  %v1185_v5 = vadd.f32 %v2037_v58, %v1184_v3 }
 0x23b   : > { %v1157_v6 = vpop.f32.mrf.mxu0 }
 0x23c   : > { %v1205_v7 = vmax.f32 %v1185_v5, 0.0  ;;  %v1158_v10 = vadd.f32 %v2037_v58, %v1157_v6 }
 0x23e   : > { %v1214_v8 = vpack.c.bf16 %v1205_v7, %v1204_v4  ;;  %v1194_v13 = vmax.f32 %v1158_v10, 0.0 }
 0x240   : > { %1318 = vmatmul.bf16.vlgmr.msrb.gmra.mxu3 %v1214_v8 }
 0x241   : > { %v1187_v9 = vpop.f32.mrf.mxu3 }
 0x242   : > { %v1188_v15 = vadd.f32 %v2037_v58, %v1187_v9 }
 0x243   : > { %v1159_v11 = vpop.f32.mrf.mxu0 }
 0x244   : > { %v1160_v12 = vadd.f32 %v2037_v58, %v1159_v11  ;;  %v1206_v18 = vmax.f32 %v1188_v15, 0.0 }
 0x246   : > { %v1195_v14 = vmax.f32 %v1160_v12, 0.0 }
 0x248   : > { %v1209_v16 = vpack.c.bf16 %v1195_v14, %v1194_v13 }
 0x249   : > { %v1189_v17 = vpop.f32.mrf.mxu3 }
 0x24a   : > { %1293 = vmatmul.bf16.gmra.mxu1 %v1209_v16  ;;  %v1190_v19 = vadd.f32 %v2037_v58, %v1189_v17 }
 0x24b   : > { %v1162_v20 = vpop.f32.mrf.mxu0 }
 0x24c   : > { %v1207_v21 = vmax.f32 %v1190_v19, 0.0  ;;  %v1163_v23 = vadd.f32 %v2037_v58, %v1162_v20 }
 0x24e   : > { %v1215_v22 = vpack.c.bf16 %v1207_v21, %v1206_v18  ;;  %v1196_v26 = vmax.f32 %v1163_v23, 0.0  ;;  %v2038_v18 = vld [vmem:[%s2579_s5] ss:$0 sm:$0xff] }
 0x250   : > { %1323 = vmatmul.bf16.gmra.mxu3 %v1215_v22 }
 0x253   : > { %v1164_v24 = vpop.f32.mrf.mxu0 }
 0x254   : > { %v1165_v25 = vadd.f32 %v2037_v58, %v1164_v24 }
 0x256   : > { %v1197_v27 = vmax.f32 %v1165_v25, 0.0 }
 0x258   : > { %v1210_v28 = vpack.c.bf16 %v1197_v27, %v1196_v26 }
 0x25a   : > { %1298 = vmatmul.bf16.gmra.mxu1 %v1210_v28 }
 0x25b   : > { %v1167_v29 = vpop.f32.mrf.mxu0 }
 0x25c   : > { %v1168_v30 = vadd.f32 %v2037_v58, %v1167_v29 }
 0x25e   : > { %v1198_v33 = vmax.f32 %v1168_v30, 0.0 }
 0x263   : > { %v1169_v31 = vpop.f32.mrf.mxu0 }
 0x264   : > { %v1170_v32 = vadd.f32 %v2037_v58, %v1169_v31 }
 0x266   : > { %v1199_v34 = vmax.f32 %v1170_v32, 0.0 }
 0x268   : > { %v1211_v35 = vpack.c.bf16 %v1199_v34, %v1198_v33 }
 0x26a   : > { %1303 = vmatmul.bf16.gmra.mxu1 %v1211_v35 }
 0x26b   : > { %v1172_v36 = vpop.f32.mrf.mxu0 }
 0x26c   : > { %v1173_v37 = vadd.f32 %v2037_v58, %v1172_v36 }
 0x26e   : > { %v1200_v40 = vmax.f32 %v1173_v37, 0.0 }
 0x273   : > { %v1174_v38 = vpop.f32.mrf.mxu0 }
 0x274   : > { %v1175_v39 = vadd.f32 %v2037_v58, %v1174_v38 }
 0x276   : > { %v1201_v47 = vmax.f32 %v1175_v39, 0.0 }
 0x278   : > { %v1212_v48 = vpack.c.bf16 %v1201_v47, %v1200_v40 }
 0x27a   : > { %1308 = vmatmul.bf16.gmra.mxu1 %v1212_v48 }
 0x27b   : > { %v1177_v49 = vpop.f32.mrf.mxu0 }
 0x27c   : > { %v1178_v50 = vadd.f32 %v2037_v58, %v1177_v49 }
 0x27e   : > { %v1202_v55 = vmax.f32 %v1178_v50, 0.0 }
 0x283   : > { %v1179_v53 = vpop.f32.mrf.mxu0 }
 0x284   : > { %v1180_v54 = vadd.f32 %v2037_v58, %v1179_v53 }
 0x286   : > { %v1203_v56 = vmax.f32 %v1180_v54, 0.0 }
 0x288   : > { %v1213_v57 = vpack.c.bf16 %v1203_v56, %v1202_v55 }
 0x28a   : > { %1313 = vmatmul.bf16.gmra.mxu1 %v1213_v57 }
 0x2b7   : > { %v1289_v59 = vpop.f32.mrf.mxu1 }
 0x2bf   : > { %v1291_v60 = vpop.f32.mrf.mxu1 }
 0x2c0   : > { %v1329_v61 = vpack.c.bf16 %v1291_v60, %v1289_v59 }
 0x2c3   : > { %v1319_v62 = vpop.f32.mrf.mxu3 }
 0x2c7   : > { %v1294_v63 = vpop.f32.mrf.mxu1 }
 0x2cb   : > { %v1321_v0 = vpop.f32.mrf.mxu3 }
 0x2cc   : > { %v1335_v7 = vpack.c.bf16 %v1321_v0, %v1319_v62 }
 0x2cf   : > { %v1296_v1 = vpop.f32.mrf.mxu1 }
 0x2d0   : > { %v1330_v2 = vpack.c.bf16 %v1296_v1, %v1294_v63 }
 0x2d3   : > { %v1324_v3 = vpop.f32.mrf.mxu3 }
 0x2d7   : > { %v1299_v4 = vpop.f32.mrf.mxu1 }
 0x2db   : > { %v1326_v5 = vpop.f32.mrf.mxu3 }
 0x2dc   : > { %v1336_v6 = vpack.c.bf16 %v1326_v5, %v1324_v3 }
 0x2de   : > { %1341 = vmatpush.bf16.msra.mxu2 %v1336_v6  ;;  %1949 = vmatpush.bf16.msra.mxu3 %v1336_v6 }
 0x2df   : > { %v1301_v58 = vpop.f32.mrf.mxu1 }
 0x2e0   : > { %v1331_v17 = vpack.c.bf16 %v1301_v58, %v1299_v4 }
 0x2e2   : > { %1342 = vmatpush.bf16.msra.mxu2 %v1335_v7  ;;  %1950 = vmatpush.bf16.msra.mxu3 %v1335_v7 }
 0x2e7   : > { %v1304_v8 = vpop.f32.mrf.mxu1 }
 0x2ef   : > { %v1306_v9 = vpop.f32.mrf.mxu1 }
 0x2f0   : > { %v1332_v16 = vpack.c.bf16 %v1306_v9, %v1304_v8 }
 0x2f7   : > { %v1309_v10 = vpop.f32.mrf.mxu1 }
 0x2ff   : > { %v1311_v11 = vpop.f32.mrf.mxu1 }
 0x300   : > { %v1333_v15 = vpack.c.bf16 %v1311_v11, %v1309_v10 }
 0x307   : > { %v1314_v12 = vpop.f32.mrf.mxu1 }
 0x30f   : > { %v1316_v13 = vpop.f32.mrf.mxu1 }
 0x310   : > { %v1334_v14 = vpack.c.bf16 %v1316_v13, %v1314_v12 }
 0x312   : > { %1343 = vmatpush.bf16.msra.mxu2 %v1334_v14  ;;  %1951 = vmatpush.bf16.msra.mxu3 %v1334_v14 }
 0x316   : > { %1344 = vmatpush.bf16.msra.mxu2 %v1333_v15  ;;  %1952 = vmatpush.bf16.msra.mxu3 %v1333_v15 }
 0x31a   : > { %1345 = vmatpush.bf16.msra.mxu2 %v1332_v16  ;;  %1953 = vmatpush.bf16.msra.mxu3 %v1332_v16 }
 0x31e   : > { %1346 = vmatpush.bf16.msra.mxu2 %v1331_v17  ;;  %1954 = vmatpush.bf16.msra.mxu3 %v1331_v17 }
 0x322   : > { %1347 = vmatpush.bf16.msra.mxu2 %v1330_v2  ;;  %1955 = vmatpush.bf16.msra.mxu3 %v1330_v2 }
 0x326   : > { %1348 = vmatpush.bf16.msra.mxu2 %v1329_v61  ;;  %1956 = vmatpush.bf16.msra.mxu3 %v1329_v61 }
 0x329   : > { %1349 = vmatmul.bf16.vlgmr.msra.gmra.mxu2 %v2519_v41  ;;  %1379 = vmatmul.bf16.vlgmr.msra.gmra.mxu3 %v2521_v42 }
 0x339   : > { %1354 = vmatmul.bf16.gmra.mxu2 %v2525_v43  ;;  %1384 = vmatmul.bf16.gmra.mxu3 %v2527_v44 }
 0x349   : > { %1359 = vmatmul.bf16.gmra.mxu2 %v2531_v45 }
 0x359   : > { %1364 = vmatmul.bf16.gmra.mxu2 %v2534_v46 }
 0x369   : > { %1369 = vmatmul.bf16.gmra.mxu2 %v2537_v51 }
 0x379   : > { %1374 = vmatmul.bf16.gmra.mxu2 %v2540_v52 }
 0x3ac   : > { %v1350_v19 = vpop.f32.mrf.mxu2  ;;  %v1380_v21 = vpop.f32.mrf.mxu3 }
 0x3ad   : > { %v1351_v41 = vadd.f32 %v2038_v18, %v1350_v19  ;;  %v1381_v51 = vadd.f32 %v2038_v18, %v1380_v21 }
 0x3af   : > { %1390 = vst [vmem:[#allocation11] sm:$0xff] %v1351_v41 }
 0x3b0   : > { %1402 = vst [vmem:[#allocation11 + $0x60] sm:$0xff] %v1381_v51 }
 0x3b4   : > { %v1352_v42 = vpop.f32.mrf.mxu2  ;;  %v1382_v22 = vpop.f32.mrf.mxu3 }
 0x3b5   : > { %v1353_v20 = vadd.f32 %v2038_v18, %v1352_v42  ;;  %v1383_v24 = vadd.f32 %v2038_v18, %v1382_v22 }
 0x3b7   : > { %1391 = vst [vmem:[#allocation11 + $0x8] sm:$0xff] %v1353_v20 }
 0x3b8   : > { %1403 = vst [vmem:[#allocation11 + $0x68] sm:$0xff] %v1383_v24 }
 0x3bc   : > { %v1355_v43 = vpop.f32.mrf.mxu2  ;;  %v1385_v26 = vpop.f32.mrf.mxu3 }
 0x3bd   : > { %v1356_v44 = vadd.f32 %v2038_v18, %v1355_v43  ;;  %v1386_v28 = vadd.f32 %v2038_v18, %v1385_v26 }
 0x3bf   : > { %1392 = vst [vmem:[#allocation11 + $0x10] sm:$0xff] %v1356_v44 }
 0x3c0   : > { %1404 = vst [vmem:[#allocation11 + $0x70] sm:$0xff] %v1386_v28 }
 0x3c4   : > { %v1357_v45 = vpop.f32.mrf.mxu2  ;;  %v1387_v30 = vpop.f32.mrf.mxu3 }
 0x3c5   : > { %v1358_v46 = vadd.f32 %v2038_v18, %v1357_v45  ;;  %v1388_v32 = vadd.f32 %v2038_v18, %v1387_v30 }
 0x3c7   : > { %1393 = vst [vmem:[#allocation11 + $0x18] sm:$0xff] %v1358_v46 }
 0x3c8   : > { %1405 = vst [vmem:[#allocation11 + $0x78] sm:$0xff] %v1388_v32 }
 0x3cc   : > { %v1360_v52 = vpop.f32.mrf.mxu2 }
 0x3cd   : > { %v1361_v23 = vadd.f32 %v2038_v18, %v1360_v52 }
 0x3cf   : > { %1394 = vst [vmem:[#allocation11 + $0x20] sm:$0xff] %v1361_v23 }
 0x3d4   : > { %v1362_v25 = vpop.f32.mrf.mxu2 }
 0x3d5   : > { %v1363_v27 = vadd.f32 %v2038_v18, %v1362_v25 }
 0x3d7   : > { %1395 = vst [vmem:[#allocation11 + $0x28] sm:$0xff] %v1363_v27 }
 0x3dc   : > { %v1365_v29 = vpop.f32.mrf.mxu2 }
 0x3dd   : > { %v1366_v31 = vadd.f32 %v2038_v18, %v1365_v29 }
 0x3df   : > { %1396 = vst [vmem:[#allocation11 + $0x30] sm:$0xff] %v1366_v31 }
 0x3e4   : > { %v1367_v33 = vpop.f32.mrf.mxu2 }
 0x3e5   : > { %v1368_v34 = vadd.f32 %v2038_v18, %v1367_v33 }
 0x3e7   : > { %1397 = vst [vmem:[#allocation11 + $0x38] sm:$0xff] %v1368_v34 }
 0x3ec   : > { %v1370_v35 = vpop.f32.mrf.mxu2 }
 0x3ed   : > { %v1371_v36 = vadd.f32 %v2038_v18, %v1370_v35 }
 0x3ef   : > { %1398 = vst [vmem:[#allocation11 + $0x40] sm:$0xff] %v1371_v36 }
 0x3f4   : > { %v1372_v37 = vpop.f32.mrf.mxu2 }
 0x3f5   : > { %v1373_v38 = vadd.f32 %v2038_v18, %v1372_v37 }
 0x3f7   : > { %1399 = vst [vmem:[#allocation11 + $0x48] sm:$0xff] %v1373_v38 }
 0x3fc   : > { %v1375_v39 = vpop.f32.mrf.mxu2 }
 0x3fd   : > { %v1376_v40 = vadd.f32 %v2038_v18, %v1375_v39 }
 0x3ff   : > { %1400 = vst [vmem:[#allocation11 + $0x50] sm:$0xff] %v1376_v40 }
 0x404   : > { %v1377_v47 = vpop.f32.mrf.mxu2 }
 0x405   : > { %v1378_v48 = vadd.f32 %v2038_v18, %v1377_v47 }
 0x407   : > { %1401 = vst [vmem:[#allocation11 + $0x58] sm:$0xff] %v1378_v48 }
 0x408 PF: > { %p1992_p7 = scmp.eq.s32.totalorder %s2346_s10, 2  ;;  %s2243_s30 = smov [#allocation11]  }
 0x409   : > { %s1411_s14 = sshll.u32 %s2243_s30, 4  ;;  %s1413_s20 = sshll.u32 %s2580_s6, 4  ;;  %s1412_s14 = int_to_ptr.vmem [resolvable:$true] %s1411_s14  ;;  %s1414_s20 = int_to_ptr.hbm [resolvable:$true] %s1413_s20 }
 0x40a   : > { %s2244_s17 = smov 128   ;;  %s2245_s24 = smov 8  }
 0x40b   : > { %1970 = dma.vmem_to_hbm [thread:$0]  (%p1992_p7), %s1412_s14, 2048, %s1414_s20, [#allocation5], %s2244_s17, %s2244_s17, %s2245_s24  }
 0x40c   : > { %2216 = dma.done.wait (%p1992_p7), [#allocation5], 2048  }
 0x40d   : > { %2218 = vsyncadd (%p1992_p7), [#allocation5], 4294965248 }
 0x40e PF: > { %p19_p1 = scmp.ge.s32.totalorder %s2302_s25, 5   ;;  %s2588_s21 = smov %s2225_s22 }
 0x40f   : > { %s2589_s22 = smov %s2229_s23  ;;  %s2590_s23 = smov %s2312_s28 }
 0x410   : > { %s2591_s24 = smov %s2302_s25  ;;  %21 = sbr.rel (!%p19_p1) target bundleno = 9 (0x9), region = 109 }
 0x415   :  { %1430 = vsyncpa [#allocation4], 1 }
 0x416   :  { %1432 = vsyncpa [#allocation4 + $0x1], 1 }
 0x417   :  { %1433 = vsyncpa [#allocation7], 1 }
 0x418   :  { %1435 = vsyncpa [#allocation7 + $0x1], 1 }
 0x419   :  { %1436 = vsyncpa [#allocation10], 1 }
 0x41a   :  { %1437 = vsyncpa [#allocation5], 1 }
 0x41b   :  { %1439 = vsyncpa [#allocation5 + $0x1], 1 }

</bundles_post_ra>
